<compile_context>
chip_gen: v7x
topology: tpu7x:2x2x1
jax: 0.10.0
libtpu: 0.0.40
codegen_flags: <defaults>
</compile_context>

<pallas_src>
import jax
import jax.numpy as jnp
from jax import lax
from jax.experimental import pallas as pl
from jax.experimental.pallas import tpu as pltpu


ACTION = 9            # LatentToActionNet always outputs 9
OUT_LANES = 128       # lane-dense output width (cols >= ACTION are zero)
N_FC = 4              # LatentToActionNet.fc has 4 Linear layers


def _pad_to(a, shape):
    pads = [(0, t - s) for s, t in zip(a.shape, shape)]
    return jnp.pad(a, pads)


# ----------------------------------------------------------------------------
# Pallas kernel: backbone last-timestep projection (tanh) + 4-layer fc stack.
#   x_ref  : [bm, K0]        f32   raw flattened image features (cast in-kernel)
#   w0_ref : [L,  K0]        bf16  lane-dense frozen projection (transposed)
#   w1..w3 : true fc shapes  bf16  [L, L/2], [L/2, L/2], [L/2, L/4]
#   w4_ref : [L/4, 128]      bf16  final fc weight, cols >= 9 zero-padded
#   b_ref  : [4, 128]        f32   fc biases, cols >= layer width are zero
#   o_ref  : [bm, 128]       f32   lane-dense output (cols >= 9 are zero)
# ----------------------------------------------------------------------------
def fused_imitation_kernel(x_ref, w0_ref, w1_ref, w2_ref, w3_ref, w4_ref,
                           b_ref, o_ref):
    x = x_ref[...].astype(jnp.bfloat16)                         # cast fused here

    # Layer 0: frozen backbone's last-timestep latent projection (+ tanh).
    # h = tanh(x @ w0^T): contract both operands on their last (lane) dim.
    h = jnp.tanh(lax.dot_general(
        x, w0_ref[...], (((1,), (1,)), ((), ())),
        preferred_element_type=jnp.float32))                    # [bm, L] f32

    bias = b_ref[...]                                           # [4, 128] f32

    # Layers 1..4: LatentToActionNet.fc (Linear->ReLU x3, Linear).
    fc_refs = (w1_ref, w2_ref, w3_ref, w4_ref)
    for i, w_ref in enumerate(fc_refs):
        w = w_ref[...]                                          # bf16
        z = jnp.dot(h.astype(jnp.bfloat16), w,
                    preferred_element_type=jnp.float32)
        z = z + bias[i:i + 1, :w.shape[1]]
        h = jnp.maximum(z, 0.0) if i < len(fc_refs) - 1 else z

    o_ref[...] = h.astype(o_ref.dtype)


# ----------------------------------------------------------------------------
# Parameter packing: de-padded bf16 weights + one tiny f32 bias slab.
# ----------------------------------------------------------------------------
def pack_params(backbone_w, imitation_params, latent_size):
    """Pack frozen-backbone + imitation weights for the fused kernel.

    NOTE (padded-lane correctness): the only padding left is the final layer's
    output width (9 -> 128).  Its weight columns AND bias entries are zero
    there and the last layer has no activation, so output cols >= 9 are
    exactly zero (no f(0) != 0 hazard).  Intermediate layers use true widths.
    """
    # Only the last LATENT columns of the backbone projection feed
    # x_out_lat[:, -1, :]; store them lane-dense ([L, K0]) so the dominant
    # weight DMA moves only the useful bytes (contract with trans_b in-kernel).
    w0 = jnp.asarray(backbone_w, jnp.float32)[:, -latent_size:].T
    w0 = w0.astype(jnp.bfloat16)                                 # [L, K0]

    fc_ws, biases = [], []
    n = len(imitation_params)
    for i, (w, b) in enumerate(imitation_params):
        w = jnp.asarray(w, jnp.float32)
        b = jnp.asarray(b, jnp.float32).reshape(1, -1)
        if i == n - 1:
            # Pad ONLY the final output width => unmasked lane-dense store.
            w = _pad_to(w, (w.shape[0], OUT_LANES))
        fc_ws.append(w.astype(jnp.bfloat16))
        biases.append(_pad_to(b, (1, OUT_LANES)))
    b_slab = jnp.concatenate(biases, axis=0).astype(jnp.float32)  # [4, 128]

    # TODO(synk): on v7x the frozen weights could additionally be stored fp8
    # (bf16 x fp8 MXU) with a per-tensor scale after the f32 accumulate to
    # halve the weight DMA again; not applicable to v5e/v6e (int8 MXU).
    return (w0, *fc_ws, b_slab)


# ----------------------------------------------------------------------------
# DynamicLatentToAction.forward (fused wrapper around one pallas_call).
# ----------------------------------------------------------------------------
def dynamic_latent_to_action(x_nchw, params, *, action_size=ACTION,
                             block_b=256):
    """block_b: batch rows per grid step for the pipelined path.
    >=256 fills the 2x256x256 MXU on v6e/v7x; >=128 suffices on v5e."""
    w0, w1, w2, w3, w4, b_slab = params
    B = x_nchw.shape[0]
    x = x_nchw.reshape(B, -1)                       # [B, K0] f32 (view, no copy)
    assert x.shape[1] == w0.shape[1], (x.shape, w0.shape)
    out_lanes = w4.shape[1]
    weight_args = (w0, w1, w2, w3, w4, b_slab)

    if B <= block_b:
        # Tiny / one-shot batch: gridless call, every operand is one
        # full-array VMEM block (no per-grid-step overhead).
        out = pl.pallas_call(
            fused_imitation_kernel,
            out_shape=jax.ShapeDtypeStruct((B, out_lanes), jnp.float32),
            in_specs=[pl.BlockSpec(memory_space=pltpu.MemorySpace.VMEM)] * 7,
            out_specs=pl.BlockSpec(memory_space=pltpu.MemorySpace.VMEM),
        )(x, *weight_args)
    else:
        # Production batch: pipeline x/out DMA over a 'parallel' batch grid.
        # Weights stay resident (constant index_map => DMA'd once).  The
        # ragged batch tail is handled by Pallas edge-block masking, so no
        # padded copy of x is materialized in HBM.  Working set per step is
        # ~2.5 MiB at block_b=256, well under the 32 MiB limit we request
        # (safe on v5e/v6e's 128 MiB and v7x's 64 MiB VMEM).
        k0 = x.shape[1]
        const = lambda i: (0, 0)
        out = pl.pallas_call(
            fused_imitation_kernel,
            out_shape=jax.ShapeDtypeStruct((B, out_lanes), jnp.float32),
            grid_spec=pltpu.PrefetchScalarGridSpec(
                num_scalar_prefetch=0,
                grid=(pl.cdiv(B, block_b),),
                in_specs=[pl.BlockSpec((block_b, k0), lambda i: (i, 0))]
                         + [pl.BlockSpec(w.shape, const) for w in weight_args],
                out_specs=pl.BlockSpec((block_b, out_lanes), lambda i: (i, 0)),
            ),
            compiler_params=pltpu.CompilerParams(
                dimension_semantics=("parallel",),
                vmem_limit_bytes=32 * 1024 * 1024),
        )(x, *weight_args)

    # torch semantics: .squeeze() — note this also drops the batch dim if B==1.
    return jnp.squeeze(out[:, :action_size])


# ----------------------------------------------------------------------------
# Parameter initialization (deterministic, synthetic — not a checkpoint load).
# Shapes follow LatentToActionNet.__init__: L -> L//2 -> L//2 -> L//4 -> 9.
# ----------------------------------------------------------------------------
def init_imitation_params(key, latent_size):
    h1 = int(latent_size / 2.0)
    h2 = int(latent_size / 2.0)
    h3 = int(latent_size / 4.0)
    dims = [(latent_size, h1), (h1, h2), (h2, h3), (h3, ACTION)]
    params = []
    for (fan_in, fan_out) in dims:
        key, kw, kb = jax.random.split(key, 3)
        bound = 1.0 / jnp.sqrt(fan_in)
        w = jax.random.uniform(kw, (fan_in, fan_out), jnp.float32, -bound, bound)
        b = jax.random.uniform(kb, (1, fan_out), jnp.float32, -bound, bound)
        params.append((w, b))
    return params


# ----------------------------------------------------------------------------
# Synthetic frozen backbone (plain-JAX reference path).
# TODO(synk): the real backbone architecture is external / not provided; this
# deterministic stand-in only reproduces the required output structure
# (a 4-tuple whose third element is a latent sequence [B, T, latent_size]).
# It uses the same bf16-operand / f32-accumulate dot as the fused kernel.
# ----------------------------------------------------------------------------
def make_backbone(key, in_features, seq_len, latent_size):
    w = jax.random.normal(key, (in_features, seq_len * latent_size),
                          jnp.float32) * 0.02

    def backbone(x_nchw):
        B = x_nchw.shape[0]
        flat = x_nchw.reshape(B, -1).astype(jnp.bfloat16)
        lat = jnp.tanh(jnp.dot(flat, w.astype(jnp.bfloat16),
                               preferred_element_type=jnp.float32))
        return None, None, lat.reshape(B, seq_len, latent_size), None

    return backbone, w


def reference_forward(x_nchw, backbone, imitation_params):
    """Full backbone -> last timestep -> fc stack (bf16 operands, f32 acc)."""
    _, _, lat_full, _ = backbone(x_nchw)            # [B, SEQ, LATENT]
    h = lat_full[:, -1, :].astype(jnp.float32)      # [B, LATENT]
    n = len(imitation_params)
    for i, (w_i, b_i) in enumerate(imitation_params):
        h = jnp.dot(h.astype(jnp.bfloat16), w_i.astype(jnp.bfloat16),
                    preferred_element_type=jnp.float32) + b_i
        if i < n - 1:
            h = jnp.maximum(h, 0.0)
    return jnp.squeeze(h)


if __name__ == "__main__":
    # Small shapes: image input NCHW [2, 4, 16, 16], seq len 8, latent 32.
    B, C, H, W = 2, 4, 16, 16
    SEQ = 8
    LATENT = 32

    key = jax.random.PRNGKey(0)
    k_x, k_bb, k_im, k_x2 = jax.random.split(key, 4)

    x = jax.random.normal(k_x, (B, C, H, W), jnp.float32)
    backbone, w_bb = make_backbone(k_bb, C * H * W, SEQ, LATENT)
    imitation_params = init_imitation_params(k_im, LATENT)
    params = pack_params(w_bb, imitation_params, LATENT)

    # --- tiny-batch (gridless) path --------------------------------------
    fwd = jax.jit(lambda xx: dynamic_latent_to_action(xx, params))
    out = jax.block_until_ready(fwd(x))
    ref = reference_forward(x, backbone, imitation_params)
    assert out.shape == (B, ACTION), out.shape
    assert jnp.allclose(out, ref, atol=1e-3, rtol=1e-3), (out, ref)

    # --- production-batch (pipelined 'parallel' grid) path, ragged tail ---
    B2 = 260                                        # 2 blocks of 256, tail of 4
    x2 = jax.random.normal(k_x2, (B2, C, H, W), jnp.float32)
    fwd2 = jax.jit(lambda xx: dynamic_latent_to_action(xx, params, block_b=256))
    out2 = jax.block_until_ready(fwd2(x2))
    ref2 = reference_forward(x2, backbone, imitation_params)
    assert out2.shape == (B2, ACTION), out2.shape
    assert jnp.allclose(out2, ref2, atol=1e-3, rtol=1e-3)

    print("KERNEL_OK")
</pallas_src>

<mosaic_0001>
module attributes {stable_mosaic.version = 11 : i64} {
  func.func @fused_imitation_kernel(%arg0: memref<2x1024xf32, #tpu.memory_space<vmem>>, %arg1: memref<32x1024xbf16, #tpu.memory_space<vmem>>, %arg2: memref<32x16xbf16, #tpu.memory_space<vmem>>, %arg3: memref<16x16xbf16, #tpu.memory_space<vmem>>, %arg4: memref<16x8xbf16, #tpu.memory_space<vmem>>, %arg5: memref<8x128xbf16, #tpu.memory_space<vmem>>, %arg6: memref<4x128xf32, #tpu.memory_space<vmem>>, %arg7: memref<2x128xf32, #tpu.memory_space<vmem>>) attributes {dimension_semantics = [], scalar_prefetch = 0 : i64, scratch_operands = 0 : i64, tpu.core_type = #tpu.core_type<tc>} {
    %c0 = arith.constant 0 : index
    %c0_0 = arith.constant 0 : index
    %0 = vector.load %arg0[%c0, %c0_0] : memref<2x1024xf32, #tpu.memory_space<vmem>>, vector<2x1024xf32>
    %1 = arith.truncf %0 : vector<2x1024xf32> to vector<2x1024xbf16>
    %c0_1 = arith.constant 0 : index
    %c0_2 = arith.constant 0 : index
    %2 = vector.load %arg1[%c0_1, %c0_2] : memref<32x1024xbf16, #tpu.memory_space<vmem>>, vector<32x1024xbf16>
    %cst = arith.constant dense<0.000000e+00> : vector<2x32xf32>
    %3 = tpu.matmul %1, %2, %cst {dimension_numbers = #tpu.dot_dimension_numbers<[1], [1], [0], [0], [0, 0, 1, 0], [], []>} : vector<2x1024xbf16>, vector<32x1024xbf16>, vector<2x32xf32> -> vector<2x32xf32>
    %4 = math.tanh %3 : vector<2x32xf32>
    %c0_3 = arith.constant 0 : index
    %c0_4 = arith.constant 0 : index
    %5 = vector.load %arg6[%c0_3, %c0_4] : memref<4x128xf32, #tpu.memory_space<vmem>>, vector<4x128xf32>
    %c0_5 = arith.constant 0 : index
    %c0_6 = arith.constant 0 : index
    %6 = vector.load %arg2[%c0_5, %c0_6] : memref<32x16xbf16, #tpu.memory_space<vmem>>, vector<32x16xbf16>
    %7 = arith.truncf %4 : vector<2x32xf32> to vector<2x32xbf16>
    %cst_7 = arith.constant dense<0.000000e+00> : vector<2x16xf32>
    %8 = tpu.matmul %7, %6, %cst_7 {dimension_numbers = #tpu.dot_dimension_numbers<[1], [0], [0], [1], [0, 0, 1, 1], [], []>} : vector<2x32xbf16>, vector<32x16xbf16>, vector<2x16xf32> -> vector<2x16xf32>
    %9 = vector.extract_strided_slice %5 {offsets = [0, 0], sizes = [1, 16], strides = [1, 1]} : vector<4x128xf32> to vector<1x16xf32>
    %10 = vector.broadcast %9 : vector<1x16xf32> to vector<2x16xf32>
    %11 = arith.addf %8, %10 : vector<2x16xf32>
    %cst_8 = arith.constant 0.000000e+00 : f32
    %12 = vector.broadcast %cst_8 : f32 to vector<2x16xf32>
    %13 = arith.maximumf %11, %12 : vector<2x16xf32>
    %c0_9 = arith.constant 0 : index
    %c0_10 = arith.constant 0 : index
    %14 = vector.load %arg3[%c0_9, %c0_10] : memref<16x16xbf16, #tpu.memory_space<vmem>>, vector<16x16xbf16>
    %15 = arith.truncf %13 : vector<2x16xf32> to vector<2x16xbf16>
    %cst_11 = arith.constant dense<0.000000e+00> : vector<2x16xf32>
    %16 = tpu.matmul %15, %14, %cst_11 {dimension_numbers = #tpu.dot_dimension_numbers<[1], [0], [0], [1], [0, 0, 1, 1], [], []>} : vector<2x16xbf16>, vector<16x16xbf16>, vector<2x16xf32> -> vector<2x16xf32>
    %17 = vector.extract_strided_slice %5 {offsets = [1, 0], sizes = [1, 16], strides = [1, 1]} : vector<4x128xf32> to vector<1x16xf32>
    %18 = vector.broadcast %17 : vector<1x16xf32> to vector<2x16xf32>
    %19 = arith.addf %16, %18 : vector<2x16xf32>
    %cst_12 = arith.constant 0.000000e+00 : f32
    %20 = vector.broadcast %cst_12 : f32 to vector<2x16xf32>
    %21 = arith.maximumf %19, %20 : vector<2x16xf32>
    %c0_13 = arith.constant 0 : index
    %c0_14 = arith.constant 0 : index
    %22 = vector.load %arg4[%c0_13, %c0_14] : memref<16x8xbf16, #tpu.memory_space<vmem>>, vector<16x8xbf16>
    %23 = arith.truncf %21 : vector<2x16xf32> to vector<2x16xbf16>
    %cst_15 = arith.constant dense<0.000000e+00> : vector<2x8xf32>
    %24 = tpu.matmul %23, %22, %cst_15 {dimension_numbers = #tpu.dot_dimension_numbers<[1], [0], [0], [1], [0, 0, 1, 1], [], []>} : vector<2x16xbf16>, vector<16x8xbf16>, vector<2x8xf32> -> vector<2x8xf32>
    %25 = vector.extract_strided_slice %5 {offsets = [2, 0], sizes = [1, 8], strides = [1, 1]} : vector<4x128xf32> to vector<1x8xf32>
    %26 = vector.broadcast %25 : vector<1x8xf32> to vector<2x8xf32>
    %27 = arith.addf %24, %26 : vector<2x8xf32>
    %cst_16 = arith.constant 0.000000e+00 : f32
    %28 = vector.broadcast %cst_16 : f32 to vector<2x8xf32>
    %29 = arith.maximumf %27, %28 : vector<2x8xf32>
    %c0_17 = arith.constant 0 : index
    %c0_18 = arith.constant 0 : index
    %30 = vector.load %arg5[%c0_17, %c0_18] : memref<8x128xbf16, #tpu.memory_space<vmem>>, vector<8x128xbf16>
    %31 = arith.truncf %29 : vector<2x8xf32> to vector<2x8xbf16>
    %cst_19 = arith.constant dense<0.000000e+00> : vector<2x128xf32>
    %32 = tpu.matmul %31, %30, %cst_19 {dimension_numbers = #tpu.dot_dimension_numbers<[1], [0], [0], [1], [0, 0, 1, 1], [], []>} : vector<2x8xbf16>, vector<8x128xbf16>, vector<2x128xf32> -> vector<2x128xf32>
    %33 = vector.extract_strided_slice %5 {offsets = [3, 0], sizes = [1, 128], strides = [1, 1]} : vector<4x128xf32> to vector<1x128xf32>
    %34 = vector.broadcast %33 : vector<1x128xf32> to vector<2x128xf32>
    %35 = arith.addf %32, %34 : vector<2x128xf32>
    %c0_20 = arith.constant 0 : index
    %c0_21 = arith.constant 0 : index
    %36 = vector.load %arg7[%c0_20, %c0_21] : memref<2x128xf32, #tpu.memory_space<vmem>>, vector<2x128xf32>
    tpu.vector_store %arg7[%c0_20, %c0_21], %35 {strides = array<i32>} : memref<2x128xf32, #tpu.memory_space<vmem>>, vector<2x128xf32>,
    return
  }
}

</mosaic_0001>

<bundles_post_ra>
// kernel: _lambda_.1
= control target key start
LH: loop header
LB: loop body
LE: loop exit
PB: predicated region body
PF: predicated region fallthrough
CT: control target
= control target key end

     0   :  { %v36_v3 = vlaneseq  ;;  %v694_v8 = vmov 1983009808   ;;  %s835_s0 = inlined_call_operand.vmem [shape: f32[2,1024], index: 0, kind: input, shape index: {}]   ;;  %s836_s1 = inlined_call_operand.vmem [shape: bf16[32,1024], index: 1, kind: input, shape index: {}]   ;;  %s837_s2 = inlined_call_operand.vmem [shape: bf16[32,16], index: 2, kind: input, shape index: {}]   ;;  %s838_s3 = inlined_call_operand.vmem [shape: bf16[16,16], index: 3, kind: input, shape index: {}]   ;;  %s839_s4 = inlined_call_operand.vmem [shape: bf16[16,8], index: 4, kind: input, shape index: {}]   ;;  %s840_s5 = inlined_call_operand.vmem [shape: bf16[8,128], index: 5, kind: input, shape index: {}]   ;;  %s841_s6 = inlined_call_operand.vmem [shape: f32[4,128], index: 6, kind: input, shape index: {}]   ;;  %s842_s7 = inlined_call_operand.hbm [shape: f32[2,128], index: 7, kind: output, shape index: {}]  }
   0x1   :  { %v83_v0 = vld [vmem:[%s836_s1 + $0x8] sm:$0xff]  ;;  %v28_v7 = vld [vmem:[%s835_s0] sm:$0xff]  ;;  %v34_v9 = vunpack.c.l.s4 %v694_v8  ;;  %v84_v16 = vld [vmem:[%s836_s1 + $0x10] sm:$0xff] }
   0x2   :  { %v87_v1 = vld [vmem:[%s836_s1 + $0x28] sm:$0xff]  ;;  %v753_v11 = vshrl.u32 %v36_v3, 7  ;;  %v32_v12 = vcombine.high %v28_v7, %v28_v7  ;;  %v82_v14 = vld [vmem:[%s836_s1] sm:$0xff]  ;;  %v88_v21 = vld [vmem:[%s836_s1 + $0x30] sm:$0xff] }
   0x3   :  { %v91_v2 = vld [vmem:[%s836_s1 + $0x48] sm:$0xff]  ;;  %v593_v4 = vcombine.high %v83_v0, %v87_v1  ;;  %v592_v5 = vcombine.low %v83_v0, %v87_v1  ;;  %v35_v13 = vunpack.c.0.s8 %v34_v9  ;;  %v86_v15 = vld [vmem:[%s836_s1 + $0x20] sm:$0xff] }
   0x4   :  { %v95_v6 = vld [vmem:[%s836_s1 + $0x68] sm:$0xff]  ;;  %v591_v17 = vcombine.high %v82_v14, %v86_v15  ;;  %v590_v18 = vcombine.low %v82_v14, %v86_v15  ;;  %v90_v19 = vld [vmem:[%s836_s1 + $0x40] sm:$0xff] }
   0x5   :  { %v601_v10 = vcombine.high %v91_v2, %v95_v6  ;;  %218 = vmatprep.subr.bf16.mxu0 %v593_v4  ;;  %v38_v20 = vsub.s32 %v35_v13, %v753_v11  ;;  %v29_v22 = vld [vmem:[%s835_s0 + $0x8] sm:$0xff]  ;;  %v94_v23 = vld [vmem:[%s836_s1 + $0x60] sm:$0xff]  ;;  %v600_v27 = vcombine.low %v91_v2, %v95_v6 }
   0x6   :  { %219 = vmatpush1.bf16.xpose.msra.mxu0 %v592_v5  ;;  %178 = vmatprep.subr.bf16.mxu1 %v591_v17  ;;  %v599_v24 = vcombine.high %v90_v19, %v94_v23 }
   0x7   :  { %220 = vmatprep.subr.bf16.mxu0 %v601_v10  ;;  %v46_v25 = vrot.slane %v32_v12, %v38_v20  ;;  %179 = vmatpush1.bf16.xpose.msra.mxu1 %v590_v18  ;;  %v39_v26 = vrot.slane %v28_v7, %v38_v20  ;;  %v56_v28 = vrot.slane %v29_v22, %v38_v20 }
   0x8   :  { %180 = vmatprep.subr.bf16.mxu1 %v599_v24 }
   0x9   :  { %12 = vsyncpa [#allocation3], 0  ;;  %v48_v29 = vcombine.high %v46_v25, %v46_v25  ;;  %v595_v30 = vcombine.high %v84_v16, %v88_v21  ;;  %v47_v31 = vcombine.high %v39_v26, %v39_v26  ;;  %v598_v33 = vcombine.low %v90_v19, %v94_v23  ;;  %v92_v36 = vld [vmem:[%s836_s1 + $0x50] sm:$0xff]  ;;  %v85_v44 = vld [vmem:[%s836_s1 + $0x18] sm:$0xff] }
   0xa   :  { %v64_v34 = vcombine.high %v56_v28, %v56_v28  ;;  %v96_v37 = vld [vmem:[%s836_s1 + $0x70] sm:$0xff]  ;;  %v76_v38 = vpack.c.bf16 %v46_v25, %v46_v25  ;;  %v594_v39 = vcombine.low %v84_v16, %v88_v21  ;;  %v74_v42 = vpack.c.bf16 %v39_v26, %v39_v26  ;;  %v89_v45 = vld [vmem:[%s836_s1 + $0x38] sm:$0xff]  ;;  %v664_v58 = vld [vmem:[%s837_s2] sm:$0xff]  }
   0xb   :  { %v77_v32 = vpack.c.bf16 %v48_v29, %v48_v29  ;;  %v75_v35 = vpack.c.bf16 %v47_v31, %v47_v31  ;;  %v603_v41 = vcombine.high %v92_v36, %v96_v37  ;;  %v49_v43 = vcombine.high %v29_v22, %v29_v22  ;;  %v93_v50 = vld [vmem:[%s836_s1 + $0x58] sm:$0xff]  ;;  %v665_v60 = vld [vmem:[%s837_s2 + $0x8] sm:$0xff]   ;;  %v666_v7 = vld [vmem:[%s838_s3] sm:$0xff]  }
   0xc   :  { %v79_v40 = vpack.c.bf16 %v64_v34, %v64_v34  ;;  %v602_v46 = vcombine.low %v92_v36, %v96_v37  ;;  %v597_v48 = vcombine.high %v85_v44, %v89_v45  ;;  %v97_v51 = vld [vmem:[%s836_s1 + $0x78] sm:$0xff]  ;;  %v78_v52 = vpack.c.bf16 %v56_v28, %v56_v28  ;;  %v339_v10 = vld [vmem:[%s841_s6] sm:$0xf] }
   0xd   :  { %250 = vmatprep.mubr.bf16.mxu0 %v77_v32  ;;  %210 = vmatprep.mubr.bf16.mxu1 %v75_v35  ;;  %v63_v47 = vrot.slane %v49_v43, %v38_v20  ;;  %v596_v53 = vcombine.low %v85_v44, %v89_v45  ;;  %v605_v55 = vcombine.high %v93_v50, %v97_v51  ;;  %v695_v59 = vmov 0.0   ;;  %v667_v19 = vld [vmem:[%s839_s4] sm:$0xff]   ;;  %s697_s4 = smov [#allocation2]  }
   0xe   :  { %221 = vmatpush1.bf16.xpose.msra.mxu0 %v600_v27  ;;  %v604_v56 = vcombine.low %v93_v50, %v97_v51  ;;  %vm696_vm0 = vmmov 0   ;;  %vm361_vm1 = vcmask 261120   ;;  %v347_v9 = vsub.s32 0, %v753_v11  ;;  %v521_v27 = vld [vmem:[%s840_s5] sm:$0xf]  ;;  %s582_s5 = sshll.u32 %s697_s4, 4  ;;  %s583_s5 = int_to_ptr.vmem [resolvable:$true] %s582_s5 }
   0xf   :  { %258 = vmatprep.subr.bf16.mxu0 %v595_v30  ;;  %181 = vmatpush1.bf16.xpose.msra.mxu1 %v598_v33  ;;  %v65_v49 = vcombine.high %v63_v47, %v63_v47  ;;  %v80_v57 = vpack.c.bf16 %v63_v47, %v63_v47  ;;  %vm419_vm2 = vcmask 130048   ;;  %v411_v21 = vsub.s32 1, %v753_v11  ;;  %s670_s21 = scalar_lea.vmem %s583_s5, 32  ;;  %p675_p1 = scmp.lt.s32.totalorder %s583_s5, %s583_s5 }
  0x10   :  { %623 = vmatprep.subr.bf16.mxu1 %v695_v59  ;;  %v348_v12 = vrot.slane %v339_v10, %v347_v9  ;;  %vm531_vm3 = vcmask 1043456   ;;  %v469_v32 = vsub.s32 2, %v753_v11  ;;  %vm527_vm4 = vcmask 64512   ;;  %p671_p0 = scmp.ne.s32.totalorder %s583_s5, %s670_s21  ;;  %p676_p2 = scmp.lt.s32.totalorder %s670_s21, %s670_s21 }
  0x11   :  { %v81_v54 = vpack.c.bf16 %v65_v49, %v65_v49  ;;  %v412_v22 = vrot.slane %v339_v10, %v411_v21  ;;  %v533_v31 = vsel %vm531_vm3, %v521_v27, 0 }
  0x12   :  { %v470_v33 = vrot.slane %v339_v10, %v469_v32  ;;  %p677_p3 = por %p676_p2, %p675_p1 }
  0x14   :  { %p678_p4 = pnand %p677_p3, %p671_p0 }
  0x15   :  { %251 = vmatmul.mubr.bf16.vlgmr.msra.gmra.mrb[0].mxu0 %v76_v38 }
  0x16   :  { %259 = vmatpush1.bf16.xpose.msra.mxu0 %v594_v39  ;;  %290 = vmatprep.mubr.bf16.mxu0 %v79_v40 }
  0x17   :  { %260 = vmatprep.subr.bf16.mxu0 %v603_v41  ;;  %211 = vmatmul.mubr.bf16.vlgmr.msra.gmra.mrb[0].mxu1 %v74_v42  ;;  %v525_v41 = vsub.s32 3, %v753_v11 }
  0x18   :  { %624 = vmatpush3.bf16.msra.mxu1 %v664_v58  ;;  %627 = vmatprep.mubr.msk.bf16.mxu1 %vm696_vm0, %v695_v59 }
  0x19   :  { %625 = vmatprep.subr.bf16.mxu1 %v695_v59  ;;  %v526_v42 = vrot.slane %v339_v10, %v525_v41 }
  0x1c   :  { %626 = vmatpush3.bf16.msra.mxu1 %v665_v60 }
  0x1d   :  { %631 = vmatprep.subr.bf16.mxu1 %v695_v59 }
  0x1e   :  { %261 = vmatpush1.bf16.xpose.msra.mxu0 %v602_v46 }
  0x1f   :  { %298 = vmatprep.subr.bf16.mxu0 %v597_v48 }
  0x25   :  { %291 = vmatmul.mubr.bf16.vlgmr.msra.gmra.mrb[0].mxu0 %v78_v52 }
  0x26   :  { %299 = vmatpush1.bf16.xpose.msra.mxu0 %v596_v53  ;;  %330 = vmatprep.mubr.bf16.mxu0 %v81_v54 }
  0x27   :  { %300 = vmatprep.subr.bf16.mxu0 %v605_v55 }
  0x2e   :  { %301 = vmatpush1.bf16.xpose.msra.mxu0 %v604_v56 }
  0x35   :  { %331 = vmatmul.mubr.bf16.vlgmr.msra.gmra.mrb[0].mxu0 %v80_v57 }
  0xea   :  { %v212_v61 = vpop.f32.mrb[0].mxu1 }
  0xeb   :  { %v214_v62 = vpop.f32.mrb[1].mxu1 }
  0xec   :  { %v215_v63 = vpop.f32.mrb[2].mxu1 }
  0xed   :  { %v216_v0 = vpop.f32.mrb[3].mxu1 }
 0x108   :  { %v332_v1 = vpop.f32.mrb[0].mxu0 }
 0x109   :  { %v649_v2 = vadd.f32 %v332_v1, %v212_v61  ;;  %v334_v3 = vpop.f32.mrb[1].mxu0 }
 0x10a   :  { %v335_v4 = vpop.f32.mrb[2].mxu0 }
 0x10b   :  { %668 = vtanh.f32 %v649_v2  ;;  %v336_v5 = vpop.f32.mrb[3].mxu0 }
 0x115   :  { %v669_v6 = vpop.eup %668 }
 0x116   :  { %v344_v8 = vpack.c.bf16 %v669_v6, %v669_v6 }
 0x118   :  { %628 = vmatmul.mubr.msk.bf16.vlgmr.msra.gmra.mrb[4].mxu1 %vm361_vm1, %v344_v8 }
 0x119   :  { %632 = vmatpush3.bf16.msra.mxu1 %v666_v7  ;;  %633 = vmatprep.mubr.msk.bf16.mxu1 %vm696_vm0, %v695_v59 }
 0x11a   :  { %637 = vmatprep.subr.bf16.mxu1 %v695_v59 }
 0x1eb   :  { %v399_v13 = vpop.f32.mrb[4].mxu1 }
 0x1ec   :  { %v400_v14 = vadd.f32 %v399_v13, %v348_v12  ;;  %v629_v15 = vpop.f32.mrb[5].mxu1 }
 0x1ed   :  { %v402_v16 = vpop.f32.mrb[6].mxu1 }
 0x1ee   :  { %v405_v17 = vmax.f32 %v400_v14, 0.0  ;;  %v630_v18 = vpop.f32.mrb[7].mxu1 }
 0x1f0   :  { %v408_v20 = vpack.c.bf16 %v405_v17, %v405_v17 }
 0x1f2   :  { %634 = vmatmul.mubr.msk.bf16.vlgmr.msra.gmra.mrb[8].mxu1 %vm419_vm2, %v408_v20 }
 0x1f3   :  { %638 = vmatpush3.bf16.msra.mxu1 %v667_v19  ;;  %639 = vmatprep.mubr.msk.bf16.mxu1 %vm696_vm0, %v695_v59 }
 0x1f4   :  { %643 = vmatprep.subr.bf16.mxu1 %v695_v59 }
 0x2c5   :  { %v457_v23 = vpop.f32.mrb[8].mxu1 }
 0x2c6   :  { %v458_v24 = vadd.f32 %v457_v23, %v412_v22  ;;  %v635_v25 = vpop.f32.mrb[9].mxu1 }
 0x2c7   :  { %v460_v26 = vpop.f32.mrb[10].mxu1 }
 0x2c8   :  { %v463_v28 = vmax.f32 %v458_v24, 0.0  ;;  %v636_v29 = vpop.f32.mrb[11].mxu1 }
 0x2ca   :  { %v466_v30 = vpack.c.bf16 %v463_v28, %v463_v28 }
 0x2cc   :  { %640 = vmatmul.mubr.msk.bf16.vlgmr.msra.gmra.mrb[12].mxu1 %vm419_vm2, %v466_v30 }
 0x2cd   :  { %644 = vmatpush3.bf16.msra.mxu1 %v533_v31  ;;  %645 = vmatprep.mubr.msk.bf16.mxu1 %vm696_vm0, %v695_v59 }
 0x39f   :  { %v514_v34 = vpop.f32.mrb[12].mxu1 }
 0x3a0   :  { %v515_v35 = vadd.f32 %v514_v34, %v470_v33  ;;  %v641_v36 = vpop.f32.mrb[13].mxu1 }
 0x3a1   :  { %v517_v37 = vpop.f32.mrb[14].mxu1 }
 0x3a2   :  { %v520_v38 = vmax.f32 %v515_v35, 0.0  ;;  %v642_v39 = vpop.f32.mrb[15].mxu1 }
 0x3a4   :  { %v522_v40 = vpack.c.bf16 %v520_v38, %v520_v38 }
 0x3a6   :  { %646 = vmatmul.mubr.msk.bf16.vlgmr.msra.gmra.mrb[16].mxu1 %vm527_vm4, %v522_v40 }
 0x479   :  { %v569_v43 = vpop.f32.mrb[16].mxu1 }
 0x47a   :  { %v570_v44 = vadd.f32 %v569_v43, %v526_v42  ;;  %v647_v45 = vpop.f32.mrb[17].mxu1 }
 0x47b   :  { %v572_v46 = vpop.f32.mrb[18].mxu1 }
 0x47c   :  { %575 = vst [vmem:[#allocation2] sm:$0x3] %v570_v44  ;;  %v648_v47 = vpop.f32.mrb[19].mxu1 }
 0x47d   :  { %681 = shalt.err (!%p678_p4)
}
 0x47e   :  { %s682_s24 = scalar_lea.hbm %s842_s7, 32 }
 0x47f   :  { %p683_p5 = scmp.ne.s32.totalorder %s842_s7, %s682_s24  ;;  %p686_p6 = scmp.lt.u32.totalorder %s682_s24, %s842_s7 }
 0x481   :  { %p688_p7 = pnand %p686_p6, %p683_p5 }
 0x483   :  { %691 = shalt.err (!%p688_p7)
}
 0x484   :  { %585 = dma.vmem_to_hbm [thread:$0]  %s583_s5, 32, %s842_s7, [#allocation3]  }
 0x485   :  { %692 = dma.done.wait [#allocation3], 32  }
 0x486   :  { %693 = vsyncadd [#allocation3], 4294967264 }
 0x487   :  { %589 = vsyncpa [#allocation3], 1 }

</bundles_post_ra>
